<compile_context>
chip_gen: v5e
topology: v5e:2x2
jax: 0.10.0
libtpu: 0.0.40
codegen_flags: <defaults>
</compile_context>

<pallas_src>
import math
import functools

import jax
import jax.numpy as jnp
from jax import lax
from jax.experimental import pallas as pl
from jax.experimental.pallas import tpu as pltpu

_NEG_INF = -1e30  # large finite negative: NaN-safe if a padded row is fully masked.


def causal_attention_kernel(x_ref, maskb_ref, wqkv_ref, bqkv_ref, wo_ref, bo_ref,
                            o_ref, *scratch_refs,
                            num_groups: int, group_size: int, head_dim: int):
    """One (batch, head-group) pair per grid step.

    x_ref:     (1, S, C)        bfloat16
    maskb_ref: (1, 1, S)        float32 additive padding bias (0 or -1e30)
    wqkv_ref:  (1, C, 3*G*hd)   bfloat16, packed [q heads | k heads | v heads]
    bqkv_ref:  (1, 1, 3*G*hd)   float32   (1/sqrt(hd) already folded into q part)
    wo_ref:    (1, G*hd, C)     bfloat16
    bo_ref:    (1, C)           float32
    o_ref:     (1, S, C)        output dtype
    scratch:   optional (S, C) f32 accumulator (only when output dtype != f32)
    """
    grp = pl.program_id(1)
    S = x_ref.shape[1]
    G, hd = group_size, head_dim
    Ghd = G * hd

    xb = x_ref[0]                                                    # (S, C) bf16

    # Fused Q/K/V projection for all G heads of this group: one lane-dense
    # (N = 3*G*hd) MXU matmul.  The 1/sqrt(hd) scale is folded into the
    # q weights / bias on the wrapper side.
    qkv = (jnp.dot(xb, wqkv_ref[0], preferred_element_type=jnp.float32)
           + bqkv_ref[0])                                            # (S, 3*G*hd) f32

    # Combined causal + padding additive mask, built once per group step.
    row = lax.broadcasted_iota(jnp.int32, (S, S), 0)
    col = lax.broadcasted_iota(jnp.int32, (S, S), 1)
    mask_add = jnp.where(col > row, _NEG_INF, 0.0) + maskb_ref[0]    # (S, S) f32

    ctx_parts = []
    for g in range(G):                                               # unrolled; G small
        qh = qkv[:, g * hd:(g + 1) * hd]
        kh = qkv[:, Ghd + g * hd:Ghd + (g + 1) * hd]
        vh = qkv[:, 2 * Ghd + g * hd:2 * Ghd + (g + 1) * hd]

        # Scores: contract the LAST dims of q and k (no kT transpose/relayout).
        s = lax.dot_general(qh.astype(jnp.bfloat16), kh.astype(jnp.bfloat16),
                            dimension_numbers=(((1,), (1,)), ((), ())),
                            preferred_element_type=jnp.float32)      # (S, S)
        s = s + mask_add

        # Softmax with deferred normalization.
        m = jnp.max(s, axis=-1, keepdims=True)
        p = jnp.exp(s - m)                                           # (S, S) f32
        # TODO(synk): on v6e/v7x the exp could be done in bf16 (bf16 EUP) to
        # halve EUP pressure; kept f32 so the same kernel also suits v5e.

        # Fuse the softmax denominator into the p@V matmul: append a ones
        # column to V and read l from the extra output column (free MXU work
        # instead of an O(S^2) cross-lane XLU reduction).
        v_aug = jnp.concatenate([vh, jnp.ones((S, 1), jnp.float32)], axis=-1)
        ctx_aug = jnp.dot(p.astype(jnp.bfloat16), v_aug.astype(jnp.bfloat16),
                          preferred_element_type=jnp.float32)        # (S, hd+1)
        l = ctx_aug[:, hd:hd + 1]                                    # (S, 1)
        ctx_parts.append(ctx_aug[:, :hd] * pl.reciprocal(l, approx=True))

    ctx_grp = ctx_parts[0] if G == 1 else jnp.concatenate(ctx_parts, axis=-1)

    # Output projection for this head group: single K = G*hd MXU reduction.
    partial = jnp.dot(ctx_grp.astype(jnp.bfloat16), wo_ref[0],
                      preferred_element_type=jnp.float32)            # (S, C)

    if scratch_refs:
        # Generic-dtype path: accumulate in an f32 VMEM scratch.
        acc_ref = scratch_refs[0]

        @pl.when(grp == 0)
        def _():
            acc_ref[...] = jnp.zeros_like(acc_ref)

        acc_ref[...] += partial

        @pl.when(grp == num_groups - 1)
        def _():
            o_ref[0] = (acc_ref[...] + bo_ref[...]).astype(o_ref.dtype)
    else:
        # f32 output: accumulate directly in the resident output block
        # (saves an (S, C) f32 scratch + one copy per batch element).
        @pl.when(grp == 0)
        def _():
            o_ref[0] = (partial + bo_ref[...]).astype(o_ref.dtype)

        @pl.when(grp > 0)
        def _():
            o_ref[0] = (o_ref[0] + partial).astype(o_ref.dtype)

    # TODO(synk): for long sequences (S >~ 512-1024 on v7x's 64 MiB VMEM,
    # ~2K on v5e/v6e) add a flash-style query-tile grid axis (tq ~ 256-512,
    # online softmax with running m/l scratch, output block (1, tq, C))
    # instead of materializing the full (S, S) score matrix per head.
    # TODO(synk): attn_drop / out_drop are nn.Dropout -> identity in eval mode.


def _vmem_capacity_bytes() -> int:
    try:
        return int(pltpu.get_tpu_info().vmem_capacity_bytes)
    except Exception:
        return 128 << 20


def _mxu_lane_target() -> int:
    """Head-group width target: 256 on v6e/v7x (256x256 MXU), 128 on v5-gen."""
    try:
        info = pltpu.get_tpu_info()
        name = f"{getattr(info, 'chip_version', '')}{getattr(info, 'version', '')}"
        if "5" in name:
            return 128
    except Exception:
        pass
    return 256


def _pick_group_size(num_heads: int, head_dim: int, lane_target: int) -> int:
    if head_dim >= lane_target:
        return 1
    g = min(num_heads, max(1, lane_target // head_dim))
    while num_heads % g:
        g -= 1
    return g


def causal_attention(x, wqkv, bqkv, wo, bo, num_heads, mask=None):
    """x: (B, S, C) float32. mask: optional bool (B, S); True = masked key position."""
    B, S, C = x.shape
    assert C % num_heads == 0
    hd = C // num_heads
    out_dtype = x.dtype

    G = _pick_group_size(num_heads, hd, _mxu_lane_target())
    num_groups = num_heads // G
    Ghd = G * hd
    scale = 1.0 / math.sqrt(hd)

    # --- wrapper-side layout plumbing: per-group fused parameter blocks -----
    # Fused Wqkv column index = qkv*C + h*hd + d.
    w = wqkv.reshape(C, 3, num_heads, hd).astype(jnp.float32)
    w = w.at[:, 0].multiply(scale)                       # fold 1/sqrt(hd) into Wq
    w = w.reshape(C, 3, num_groups, G, hd)
    # Per-group lane layout: [q_h0 .. q_h{G-1} | k_h0 .. | v_h0 ..]
    wqkv_g = jnp.transpose(w, (2, 0, 1, 3, 4)).reshape(num_groups, C, 3 * Ghd)
    wqkv_g = wqkv_g.astype(jnp.bfloat16)

    b3 = bqkv.reshape(3, num_heads, hd).astype(jnp.float32)
    b3 = b3.at[0].multiply(scale)                        # fold 1/sqrt(hd) into bq
    b3 = b3.reshape(3, num_groups, G, hd)
    bqkv_g = jnp.transpose(b3, (1, 0, 2, 3)).reshape(num_groups, 1, 3 * Ghd)

    wo_g = wo.reshape(num_groups, Ghd, C).astype(jnp.bfloat16)   # rows: h*hd + d
    bo2 = bo.reshape(1, C).astype(jnp.float32)

    x_bf16 = x.astype(jnp.bfloat16)
    if mask is None:
        maskb = jnp.zeros((B, 1, S), jnp.float32)
    else:
        maskb = jnp.where(mask.reshape(B, 1, S),
                          jnp.float32(_NEG_INF), jnp.float32(0.0))

    use_out_acc = (out_dtype == jnp.float32)
    scratch_shapes = [] if use_out_acc else [pltpu.VMEM((S, C), jnp.float32)]

    kernel = functools.partial(causal_attention_kernel, num_groups=num_groups,
                               group_size=G, head_dim=hd)

    # Scoped-VMEM budget (generation aware: v7x has only 64 MiB physical VMEM;
    # v5e's scoped default is 16 MiB so an explicit limit matters there too).
    bf16, f32 = 2, 4
    est = (2 * S * C * bf16               # x block, double-buffered
           + 2 * S * f32                  # padding bias
           + 2 * C * 3 * Ghd * bf16       # fused Wqkv group block
           + 2 * 3 * Ghd * f32            # fused bias block
           + 2 * Ghd * C * bf16           # Wo group block
           + 2 * C * f32                  # bo
           + 2 * S * C * f32              # output block, double-buffered
           + (0 if use_out_acc else S * C * f32)   # optional acc scratch
           + S * 3 * Ghd * f32            # fused qkv activations
           + 4 * S * S * f32              # score / prob temporaries
           + 4 * S * Ghd * f32)           # ctx parts / v_aug temporaries
    cap = min(48 << 20, (_vmem_capacity_bytes() * 5) // 8)   # ~40 MiB on v7x
    vmem_limit = int(min(max(est + (4 << 20), 16 << 20), cap))

    # TODO(synk): with grid (B, num_groups) the group weight blocks are
    # re-fetched for every batch element; for decode-like shapes (small S,
    # large B) hoist the full weight set into a persistent VMEM scratch or
    # raise pipeline depth on the weight specs (pipeline_mode=pl.Buffered(3)).
    return pl.pallas_call(
        kernel,
        out_shape=jax.ShapeDtypeStruct((B, S, C), out_dtype),
        grid_spec=pltpu.PrefetchScalarGridSpec(
            num_scalar_prefetch=0,
            grid=(B, num_groups),
            in_specs=[
                pl.BlockSpec((1, S, C), lambda b, g: (b, 0, 0)),        # x (bf16)
                pl.BlockSpec((1, 1, S), lambda b, g: (b, 0, 0)),        # pad bias
                pl.BlockSpec((1, C, 3 * Ghd), lambda b, g: (g, 0, 0)),  # Wqkv[group]
                pl.BlockSpec((1, 1, 3 * Ghd), lambda b, g: (g, 0, 0)),  # bqkv[group]
                pl.BlockSpec((1, Ghd, C), lambda b, g: (g, 0, 0)),      # Wo[group]
                pl.BlockSpec((1, C), lambda b, g: (0, 0)),              # bo
            ],
            out_specs=pl.BlockSpec((1, S, C), lambda b, g: (b, 0, 0)),
            scratch_shapes=scratch_shapes,
        ),
        compiler_params=pltpu.CompilerParams(
            dimension_semantics=("parallel", "arbitrary"),
            vmem_limit_bytes=vmem_limit,
        ),
    )(x_bf16, maskb, wqkv_g, bqkv_g, wo_g, bo2)


def reference_attention(x, wqkv, bqkv, wo, bo, num_heads, mask=None):
    """Pure-JAX f32 reference mirroring the PyTorch forward (eval mode)."""
    B, S, C = x.shape
    hd = C // num_heads
    qkv = x @ wqkv + bqkv                                           # (B, S, 3C)
    qkv = qkv.reshape(B, S, 3, num_heads, hd)
    q = jnp.transpose(qkv[:, :, 0], (0, 2, 1, 3))                   # (B, nh, S, hd)
    k = jnp.transpose(qkv[:, :, 1], (0, 2, 1, 3))
    v = jnp.transpose(qkv[:, :, 2], (0, 2, 1, 3))
    attn = jnp.einsum('bhqd,bhkd->bhqk', q, k) / math.sqrt(hd)
    combined = jnp.triu(jnp.ones((S, S), bool), 1)[None, None]
    if mask is not None:
        combined = jnp.logical_or(combined, mask.reshape(B, 1, 1, S))
    attn = jnp.where(combined, -jnp.inf, attn)
    attn = jax.nn.softmax(attn, axis=-1)
    y = jnp.einsum('bhqk,bhkd->bhqd', attn, v)
    y = jnp.transpose(y, (0, 2, 1, 3)).reshape(B, S, C)
    return y @ wo + bo


if __name__ == "__main__":
    # Small shapes consistent with the module: hidden_size=32, num_heads=4,
    # context_size=8, batch=2, seq=8.
    B, S, C, NH = 2, 8, 32, 4

    key = jax.random.PRNGKey(0)
    kx, k1, k2, k3, k4 = jax.random.split(key, 5)
    x = jax.random.normal(kx, (B, S, C), jnp.float32)
    # JAX convention: y = x @ W + b.
    wqkv = jax.random.normal(k1, (C, 3 * C), jnp.float32) * 0.05
    bqkv = jax.random.normal(k2, (1, 3 * C), jnp.float32) * 0.05
    wo = jax.random.normal(k3, (C, C), jnp.float32) * 0.05
    bo = jax.random.normal(k4, (1, C), jnp.float32) * 0.05

    # mask=None path (PyTorch default forward).
    out = jax.block_until_ready(causal_attention(x, wqkv, bqkv, wo, bo, NH))
    ref = reference_attention(x, wqkv, bqkv, wo, bo, NH)
    assert out.shape == (B, S, C)
    assert jnp.allclose(out, ref, rtol=2e-2, atol=2e-2), "mismatch vs reference (no mask)"

    # Padding-mask path (pad the tail of the second sequence; no fully-masked rows).
    pad = jnp.zeros((B, S), bool).at[1, S - 2:].set(True)
    out_m = jax.block_until_ready(
        causal_attention(x, wqkv, bqkv, wo, bo, NH, mask=pad))
    ref_m = reference_attention(x, wqkv, bqkv, wo, bo, NH, mask=pad)
    assert jnp.allclose(out_m, ref_m, rtol=2e-2, atol=2e-2), "mismatch vs reference (mask)"

    print("KERNEL_OK")
</pallas_src>

<mosaic_0001>
module attributes {stable_mosaic.version = 11 : i64} {
  func.func @causal_attention_kernel(%arg0: i32, %arg1: i32, %arg2: memref<1x8x32xbf16, #tpu.memory_space<vmem>>, %arg3: memref<1x1x8xf32, #tpu.memory_space<vmem>>, %arg4: memref<1x32x96xbf16, #tpu.memory_space<vmem>>, %arg5: memref<1x1x96xf32, #tpu.memory_space<vmem>>, %arg6: memref<1x32x32xbf16, #tpu.memory_space<vmem>>, %arg7: memref<1x32xf32, #tpu.memory_space<vmem>>, %arg8: memref<1x8x32xf32, #tpu.memory_space<vmem>>) attributes {dimension_semantics = [#tpu.dimension_semantics<parallel>, #tpu.dimension_semantics<arbitrary>], iteration_bounds = array<i64: 2, 1>, scalar_prefetch = 0 : i64, scratch_operands = 0 : i64, tpu.core_type = #tpu.core_type<tc>, window_params = [{transform_indices = @transform_0, window_bounds = array<i64: 1, 8, 32>}, {transform_indices = @transform_1, window_bounds = array<i64: 1, 1, 8>}, {transform_indices = @transform_2, window_bounds = array<i64: 1, 32, 96>}, {transform_indices = @transform_3, window_bounds = array<i64: 1, 1, 96>}, {transform_indices = @transform_4, window_bounds = array<i64: 1, 32, 32>}, {pipeline_mode = #tpu.pipeline_mode<synchronous>, transform_indices = @transform_5, window_bounds = array<i64: 1, 32>}, {transform_indices = @transform_6, window_bounds = array<i64: 1, 8, 32>}]} {
    %c0 = arith.constant 0 : index
    %c0_0 = arith.constant 0 : index
    %c0_1 = arith.constant 0 : index
    %0 = vector.load %arg2[%c0, %c0_0, %c0_1] : memref<1x8x32xbf16, #tpu.memory_space<vmem>>, vector<1x8x32xbf16>
    %1 = vector.shape_cast %0 : vector<1x8x32xbf16> to vector<8x32xbf16>
    %c0_2 = arith.constant 0 : index
    %c0_3 = arith.constant 0 : index
    %c0_4 = arith.constant 0 : index
    %2 = vector.load %arg4[%c0_2, %c0_3, %c0_4] : memref<1x32x96xbf16, #tpu.memory_space<vmem>>, vector<1x32x96xbf16>
    %3 = vector.shape_cast %2 : vector<1x32x96xbf16> to vector<32x96xbf16>
    %cst = arith.constant dense<0.000000e+00> : vector<8x96xf32>
    %4 = tpu.matmul %1, %3, %cst {dimension_numbers = #tpu.dot_dimension_numbers<[1], [0], [0], [1], [0, 0, 1, 1], [], []>} : vector<8x32xbf16>, vector<32x96xbf16>, vector<8x96xf32> -> vector<8x96xf32>
    %c0_5 = arith.constant 0 : index
    %c0_6 = arith.constant 0 : index
    %c0_7 = arith.constant 0 : index
    %5 = vector.load %arg5[%c0_5, %c0_6, %c0_7] : memref<1x1x96xf32, #tpu.memory_space<vmem>>, vector<1x1x96xf32>
    %6 = vector.shape_cast %5 : vector<1x1x96xf32> to vector<1x96xf32>
    %7 = vector.broadcast %6 : vector<1x96xf32> to vector<8x96xf32>
    %8 = arith.addf %4, %7 : vector<8x96xf32>
    %9 = tpu.iota {dimensions = array<i32: 0>} : vector<8x8xi32>
    %10 = tpu.iota {dimensions = array<i32: 1>} : vector<8x8xi32>
    %11 = arith.cmpi sgt, %10, %9 : vector<8x8xi32>
    %cst_8 = arith.constant -1.000000e+30 : f32
    %cst_9 = arith.constant 0.000000e+00 : f32
    %12 = vector.broadcast %cst_8 : f32 to vector<8x8xf32>
    %13 = vector.broadcast %cst_9 : f32 to vector<8x8xf32>
    %14 = arith.select %11, %12, %13 : vector<8x8xi1>, vector<8x8xf32>
    %c0_10 = arith.constant 0 : index
    %c0_11 = arith.constant 0 : index
    %c0_12 = arith.constant 0 : index
    %15 = vector.load %arg3[%c0_10, %c0_11, %c0_12] : memref<1x1x8xf32, #tpu.memory_space<vmem>>, vector<1x1x8xf32>
    %16 = vector.shape_cast %15 : vector<1x1x8xf32> to vector<1x8xf32>
    %17 = vector.broadcast %16 : vector<1x8xf32> to vector<8x8xf32>
    %18 = arith.addf %14, %17 : vector<8x8xf32>
    %19 = vector.extract_strided_slice %8 {offsets = [0, 0], sizes = [8, 8], strides = [1, 1]} : vector<8x96xf32> to vector<8x8xf32>
    %20 = vector.extract_strided_slice %8 {offsets = [0, 32], sizes = [8, 8], strides = [1, 1]} : vector<8x96xf32> to vector<8x8xf32>
    %21 = vector.extract_strided_slice %8 {offsets = [0, 64], sizes = [8, 8], strides = [1, 1]} : vector<8x96xf32> to vector<8x8xf32>
    %22 = arith.truncf %19 : vector<8x8xf32> to vector<8x8xbf16>
    %23 = arith.truncf %20 : vector<8x8xf32> to vector<8x8xbf16>
    %cst_13 = arith.constant dense<0.000000e+00> : vector<8x8xf32>
    %24 = tpu.matmul %22, %23, %cst_13 {dimension_numbers = #tpu.dot_dimension_numbers<[1], [1], [0], [0], [0, 0, 1, 0], [], []>} : vector<8x8xbf16>, vector<8x8xbf16>, vector<8x8xf32> -> vector<8x8xf32>
    %25 = arith.addf %24, %18 : vector<8x8xf32>
    %cst_14 = arith.constant dense<0xFF800000> : vector<8xf32>
    %26 = vector.multi_reduction <maximumf>, %25, %cst_14 [1] : vector<8x8xf32> to vector<8xf32>
    %27 = vector.shape_cast %26 : vector<8xf32> to vector<8x1xf32>
    %28 = vector.broadcast %27 : vector<8x1xf32> to vector<8x8xf32>
    %29 = arith.subf %25, %28 : vector<8x8xf32>
    %30 = math.exp %29 : vector<8x8xf32>
    %cst_15 = arith.constant 1.000000e+00 : f32
    %31 = vector.broadcast %cst_15 : f32 to vector<8x1xf32>
    %32 = tpu.concatenate %21, %31 in 1 : vector<8x8xf32>, vector<8x1xf32> -> vector<8x9xf32>
    %33 = arith.truncf %30 : vector<8x8xf32> to vector<8x8xbf16>
    %34 = arith.truncf %32 : vector<8x9xf32> to vector<8x9xbf16>
    %cst_16 = arith.constant dense<0.000000e+00> : vector<8x9xf32>
    %35 = tpu.matmul %33, %34, %cst_16 {dimension_numbers = #tpu.dot_dimension_numbers<[1], [0], [0], [1], [0, 0, 1, 1], [], []>} : vector<8x8xbf16>, vector<8x9xbf16>, vector<8x9xf32> -> vector<8x9xf32>
    %36 = vector.extract_strided_slice %35 {offsets = [0, 8], sizes = [8, 1], strides = [1, 1]} : vector<8x9xf32> to vector<8x1xf32>
    %37 = vector.extract_strided_slice %35 {offsets = [0, 0], sizes = [8, 8], strides = [1, 1]} : vector<8x9xf32> to vector<8x8xf32>
    %38 = tpu.reciprocal %36 {approx = true} : vector<8x1xf32> -> vector<8x1xf32>
    %39 = vector.broadcast %38 : vector<8x1xf32> to vector<8x8xf32>
    %40 = arith.mulf %37, %39 : vector<8x8xf32>
    %41 = vector.extract_strided_slice %8 {offsets = [0, 8], sizes = [8, 8], strides = [1, 1]} : vector<8x96xf32> to vector<8x8xf32>
    %42 = vector.extract_strided_slice %8 {offsets = [0, 40], sizes = [8, 8], strides = [1, 1]} : vector<8x96xf32> to vector<8x8xf32>
    %43 = vector.extract_strided_slice %8 {offsets = [0, 72], sizes = [8, 8], strides = [1, 1]} : vector<8x96xf32> to vector<8x8xf32>
    %44 = arith.truncf %41 : vector<8x8xf32> to vector<8x8xbf16>
    %45 = arith.truncf %42 : vector<8x8xf32> to vector<8x8xbf16>
    %cst_17 = arith.constant dense<0.000000e+00> : vector<8x8xf32>
    %46 = tpu.matmul %44, %45, %cst_17 {dimension_numbers = #tpu.dot_dimension_numbers<[1], [1], [0], [0], [0, 0, 1, 0], [], []>} : vector<8x8xbf16>, vector<8x8xbf16>, vector<8x8xf32> -> vector<8x8xf32>
    %47 = arith.addf %46, %18 : vector<8x8xf32>
    %cst_18 = arith.constant dense<0xFF800000> : vector<8xf32>
    %48 = vector.multi_reduction <maximumf>, %47, %cst_18 [1] : vector<8x8xf32> to vector<8xf32>
    %49 = vector.shape_cast %48 : vector<8xf32> to vector<8x1xf32>
    %50 = vector.broadcast %49 : vector<8x1xf32> to vector<8x8xf32>
    %51 = arith.subf %47, %50 : vector<8x8xf32>
    %52 = math.exp %51 : vector<8x8xf32>
    %cst_19 = arith.constant 1.000000e+00 : f32
    %53 = vector.broadcast %cst_19 : f32 to vector<8x1xf32>
    %54 = tpu.concatenate %43, %53 in 1 : vector<8x8xf32>, vector<8x1xf32> -> vector<8x9xf32>
    %55 = arith.truncf %52 : vector<8x8xf32> to vector<8x8xbf16>
    %56 = arith.truncf %54 : vector<8x9xf32> to vector<8x9xbf16>
    %cst_20 = arith.constant dense<0.000000e+00> : vector<8x9xf32>
    %57 = tpu.matmul %55, %56, %cst_20 {dimension_numbers = #tpu.dot_dimension_numbers<[1], [0], [0], [1], [0, 0, 1, 1], [], []>} : vector<8x8xbf16>, vector<8x9xbf16>, vector<8x9xf32> -> vector<8x9xf32>
    %58 = vector.extract_strided_slice %57 {offsets = [0, 8], sizes = [8, 1], strides = [1, 1]} : vector<8x9xf32> to vector<8x1xf32>
    %59 = vector.extract_strided_slice %57 {offsets = [0, 0], sizes = [8, 8], strides = [1, 1]} : vector<8x9xf32> to vector<8x8xf32>
    %60 = tpu.reciprocal %58 {approx = true} : vector<8x1xf32> -> vector<8x1xf32>
    %61 = vector.broadcast %60 : vector<8x1xf32> to vector<8x8xf32>
    %62 = arith.mulf %59, %61 : vector<8x8xf32>
    %63 = vector.extract_strided_slice %8 {offsets = [0, 16], sizes = [8, 8], strides = [1, 1]} : vector<8x96xf32> to vector<8x8xf32>
    %64 = vector.extract_strided_slice %8 {offsets = [0, 48], sizes = [8, 8], strides = [1, 1]} : vector<8x96xf32> to vector<8x8xf32>
    %65 = vector.extract_strided_slice %8 {offsets = [0, 80], sizes = [8, 8], strides = [1, 1]} : vector<8x96xf32> to vector<8x8xf32>
    %66 = arith.truncf %63 : vector<8x8xf32> to vector<8x8xbf16>
    %67 = arith.truncf %64 : vector<8x8xf32> to vector<8x8xbf16>
    %cst_21 = arith.constant dense<0.000000e+00> : vector<8x8xf32>
    %68 = tpu.matmul %66, %67, %cst_21 {dimension_numbers = #tpu.dot_dimension_numbers<[1], [1], [0], [0], [0, 0, 1, 0], [], []>} : vector<8x8xbf16>, vector<8x8xbf16>, vector<8x8xf32> -> vector<8x8xf32>
    %69 = arith.addf %68, %18 : vector<8x8xf32>
    %cst_22 = arith.constant dense<0xFF800000> : vector<8xf32>
    %70 = vector.multi_reduction <maximumf>, %69, %cst_22 [1] : vector<8x8xf32> to vector<8xf32>
    %71 = vector.shape_cast %70 : vector<8xf32> to vector<8x1xf32>
    %72 = vector.broadcast %71 : vector<8x1xf32> to vector<8x8xf32>
    %73 = arith.subf %69, %72 : vector<8x8xf32>
    %74 = math.exp %73 : vector<8x8xf32>
    %cst_23 = arith.constant 1.000000e+00 : f32
    %75 = vector.broadcast %cst_23 : f32 to vector<8x1xf32>
    %76 = tpu.concatenate %65, %75 in 1 : vector<8x8xf32>, vector<8x1xf32> -> vector<8x9xf32>
    %77 = arith.truncf %74 : vector<8x8xf32> to vector<8x8xbf16>
    %78 = arith.truncf %76 : vector<8x9xf32> to vector<8x9xbf16>
    %cst_24 = arith.constant dense<0.000000e+00> : vector<8x9xf32>
    %79 = tpu.matmul %77, %78, %cst_24 {dimension_numbers = #tpu.dot_dimension_numbers<[1], [0], [0], [1], [0, 0, 1, 1], [], []>} : vector<8x8xbf16>, vector<8x9xbf16>, vector<8x9xf32> -> vector<8x9xf32>
    %80 = vector.extract_strided_slice %79 {offsets = [0, 8], sizes = [8, 1], strides = [1, 1]} : vector<8x9xf32> to vector<8x1xf32>
    %81 = vector.extract_strided_slice %79 {offsets = [0, 0], sizes = [8, 8], strides = [1, 1]} : vector<8x9xf32> to vector<8x8xf32>
    %82 = tpu.reciprocal %80 {approx = true} : vector<8x1xf32> -> vector<8x1xf32>
    %83 = vector.broadcast %82 : vector<8x1xf32> to vector<8x8xf32>
    %84 = arith.mulf %81, %83 : vector<8x8xf32>
    %85 = vector.extract_strided_slice %8 {offsets = [0, 24], sizes = [8, 8], strides = [1, 1]} : vector<8x96xf32> to vector<8x8xf32>
    %86 = vector.extract_strided_slice %8 {offsets = [0, 56], sizes = [8, 8], strides = [1, 1]} : vector<8x96xf32> to vector<8x8xf32>
    %87 = vector.extract_strided_slice %8 {offsets = [0, 88], sizes = [8, 8], strides = [1, 1]} : vector<8x96xf32> to vector<8x8xf32>
    %88 = arith.truncf %85 : vector<8x8xf32> to vector<8x8xbf16>
    %89 = arith.truncf %86 : vector<8x8xf32> to vector<8x8xbf16>
    %cst_25 = arith.constant dense<0.000000e+00> : vector<8x8xf32>
    %90 = tpu.matmul %88, %89, %cst_25 {dimension_numbers = #tpu.dot_dimension_numbers<[1], [1], [0], [0], [0, 0, 1, 0], [], []>} : vector<8x8xbf16>, vector<8x8xbf16>, vector<8x8xf32> -> vector<8x8xf32>
    %91 = arith.addf %90, %18 : vector<8x8xf32>
    %cst_26 = arith.constant dense<0xFF800000> : vector<8xf32>
    %92 = vector.multi_reduction <maximumf>, %91, %cst_26 [1] : vector<8x8xf32> to vector<8xf32>
    %93 = vector.shape_cast %92 : vector<8xf32> to vector<8x1xf32>
    %94 = vector.broadcast %93 : vector<8x1xf32> to vector<8x8xf32>
    %95 = arith.subf %91, %94 : vector<8x8xf32>
    %96 = math.exp %95 : vector<8x8xf32>
    %cst_27 = arith.constant 1.000000e+00 : f32
    %97 = vector.broadcast %cst_27 : f32 to vector<8x1xf32>
    %98 = tpu.concatenate %87, %97 in 1 : vector<8x8xf32>, vector<8x1xf32> -> vector<8x9xf32>
    %99 = arith.truncf %96 : vector<8x8xf32> to vector<8x8xbf16>
    %100 = arith.truncf %98 : vector<8x9xf32> to vector<8x9xbf16>
    %cst_28 = arith.constant dense<0.000000e+00> : vector<8x9xf32>
    %101 = tpu.matmul %99, %100, %cst_28 {dimension_numbers = #tpu.dot_dimension_numbers<[1], [0], [0], [1], [0, 0, 1, 1], [], []>} : vector<8x8xbf16>, vector<8x9xbf16>, vector<8x9xf32> -> vector<8x9xf32>
    %102 = vector.extract_strided_slice %101 {offsets = [0, 8], sizes = [8, 1], strides = [1, 1]} : vector<8x9xf32> to vector<8x1xf32>
    %103 = vector.extract_strided_slice %101 {offsets = [0, 0], sizes = [8, 8], strides = [1, 1]} : vector<8x9xf32> to vector<8x8xf32>
    %104 = tpu.reciprocal %102 {approx = true} : vector<8x1xf32> -> vector<8x1xf32>
    %105 = vector.broadcast %104 : vector<8x1xf32> to vector<8x8xf32>
    %106 = arith.mulf %103, %105 : vector<8x8xf32>
    %107 = tpu.concatenate %40, %62, %84, %106 in 1 : vector<8x8xf32>, vector<8x8xf32>, vector<8x8xf32>, vector<8x8xf32> -> vector<8x32xf32>
    %108 = arith.truncf %107 : vector<8x32xf32> to vector<8x32xbf16>
    %c0_29 = arith.constant 0 : index
    %c0_30 = arith.constant 0 : index
    %c0_31 = arith.constant 0 : index
    %109 = vector.load %arg6[%c0_29, %c0_30, %c0_31] : memref<1x32x32xbf16, #tpu.memory_space<vmem>>, vector<1x32x32xbf16>
    %110 = vector.shape_cast %109 : vector<1x32x32xbf16> to vector<32x32xbf16>
    %cst_32 = arith.constant dense<0.000000e+00> : vector<8x32xf32>
    %111 = tpu.matmul %108, %110, %cst_32 {dimension_numbers = #tpu.dot_dimension_numbers<[1], [0], [0], [1], [0, 0, 1, 1], [], []>} : vector<8x32xbf16>, vector<32x32xbf16>, vector<8x32xf32> -> vector<8x32xf32>
    %c0_i32 = arith.constant 0 : i32
    %112 = arith.cmpi eq, %arg1, %c0_i32 : i32
    %113 = arith.extui %112 : i1 to i32
    %c0_i32_33 = arith.constant 0 : i32
    %114 = arith.cmpi ne, %113, %c0_i32_33 : i32
    scf.if %114 {
      %c0_36 = arith.constant 0 : index
      %c0_37 = arith.constant 0 : index
      %118 = vector.load %arg7[%c0_36, %c0_37] : memref<1x32xf32, #tpu.memory_space<vmem>>, vector<1x32xf32>
      %119 = vector.broadcast %118 : vector<1x32xf32> to vector<8x32xf32>
      %120 = arith.addf %111, %119 : vector<8x32xf32>
      %c0_38 = arith.constant 0 : index
      %c0_39 = arith.constant 0 : index
      %c0_40 = arith.constant 0 : index
      %121 = vector.load %arg8[%c0_38, %c0_39, %c0_40] : memref<1x8x32xf32, #tpu.memory_space<vmem>>, vector<1x8x32xf32>
      %122 = vector.shape_cast %121 : vector<1x8x32xf32> to vector<8x32xf32>
      %123 = vector.shape_cast %120 : vector<8x32xf32> to vector<1x8x32xf32>
      tpu.vector_store %arg8[%c0_38, %c0_39, %c0_40], %123 {strides = array<i32>} : memref<1x8x32xf32, #tpu.memory_space<vmem>>, vector<1x8x32xf32>,
    } else {
    }
    %c0_i32_34 = arith.constant 0 : i32
    %115 = arith.cmpi sgt, %arg1, %c0_i32_34 : i32
    %116 = arith.extui %115 : i1 to i32
    %c0_i32_35 = arith.constant 0 : i32
    %117 = arith.cmpi ne, %116, %c0_i32_35 : i32
    scf.if %117 {
      %c0_36 = arith.constant 0 : index
      %c0_37 = arith.constant 0 : index
      %c0_38 = arith.constant 0 : index
      %118 = vector.load %arg8[%c0_36, %c0_37, %c0_38] : memref<1x8x32xf32, #tpu.memory_space<vmem>>, vector<1x8x32xf32>
      %119 = vector.shape_cast %118 : vector<1x8x32xf32> to vector<8x32xf32>
      %120 = arith.addf %119, %111 : vector<8x32xf32>
      %c0_39 = arith.constant 0 : index
      %c0_40 = arith.constant 0 : index
      %c0_41 = arith.constant 0 : index
      %121 = vector.load %arg8[%c0_39, %c0_40, %c0_41] : memref<1x8x32xf32, #tpu.memory_space<vmem>>, vector<1x8x32xf32>
      %122 = vector.shape_cast %121 : vector<1x8x32xf32> to vector<8x32xf32>
      %123 = vector.shape_cast %120 : vector<8x32xf32> to vector<1x8x32xf32>
      tpu.vector_store %arg8[%c0_39, %c0_40, %c0_41], %123 {strides = array<i32>} : memref<1x8x32xf32, #tpu.memory_space<vmem>>, vector<1x8x32xf32>,
    } else {
    }
    return
  }
  func.func @transform_0(%arg0: i32, %arg1: i32) -> (i32, i32, i32) {
    %c0_i32 = arith.constant 0 : i32
    %c0_i32_0 = arith.constant 0 : i32
    %c0_i32_1 = arith.constant 0 : i32
    return %arg0, %c0_i32, %c0_i32_0 : i32, i32, i32
  }
  func.func @transform_1(%arg0: i32, %arg1: i32) -> (i32, i32, i32) {
    %c0_i32 = arith.constant 0 : i32
    %c0_i32_0 = arith.constant 0 : i32
    %c0_i32_1 = arith.constant 0 : i32
    return %arg0, %c0_i32, %c0_i32_0 : i32, i32, i32
  }
  func.func @transform_2(%arg0: i32, %arg1: i32) -> (i32, i32, i32) {
    %c0_i32 = arith.constant 0 : i32
    %c0_i32_0 = arith.constant 0 : i32
    %c0_i32_1 = arith.constant 0 : i32
    return %arg1, %c0_i32, %c0_i32_0 : i32, i32, i32
  }
  func.func @transform_3(%arg0: i32, %arg1: i32) -> (i32, i32, i32) {
    %c0_i32 = arith.constant 0 : i32
    %c0_i32_0 = arith.constant 0 : i32
    %c0_i32_1 = arith.constant 0 : i32
    return %arg1, %c0_i32, %c0_i32_0 : i32, i32, i32
  }
  func.func @transform_4(%arg0: i32, %arg1: i32) -> (i32, i32, i32) {
    %c0_i32 = arith.constant 0 : i32
    %c0_i32_0 = arith.constant 0 : i32
    %c0_i32_1 = arith.constant 0 : i32
    return %arg1, %c0_i32, %c0_i32_0 : i32, i32, i32
  }
  func.func @transform_5(%arg0: i32, %arg1: i32) -> (i32, i32) {
    %c0_i32 = arith.constant 0 : i32
    %c0_i32_0 = arith.constant 0 : i32
    %c0_i32_1 = arith.constant 0 : i32
    return %c0_i32, %c0_i32_0 : i32, i32
  }
  func.func @transform_6(%arg0: i32, %arg1: i32) -> (i32, i32, i32) {
    %c0_i32 = arith.constant 0 : i32
    %c0_i32_0 = arith.constant 0 : i32
    %c0_i32_1 = arith.constant 0 : i32
    return %arg0, %c0_i32, %c0_i32_0 : i32, i32, i32
  }
}

</mosaic_0001>

<bundles_post_ra>
// kernel: tpu_custom_call.1
= control target key start
LH: loop header
LB: loop body
LE: loop exit
PB: predicated region body
PF: predicated region fallthrough
CT: control target
= control target key end

     0   :  { %s1544_s0 = inlined_call_operand.hbm [shape: bf16[2,8,32], index: 0, kind: input, shape index: {}]   ;;  %s1545_s1 = inlined_call_operand.hbm [shape: f32[2,1,8], index: 1, kind: input, shape index: {}]   ;;  %s1546_s2 = inlined_call_operand.hbm [shape: bf16[1,32,96], index: 2, kind: input, shape index: {}]   ;;  %s1547_s3 = inlined_call_operand.vmem [shape: f32[1,1,96], index: 3, kind: input, shape index: {}]   ;;  %s1548_s4 = inlined_call_operand.hbm [shape: bf16[1,32,32], index: 4, kind: input, shape index: {}]   ;;  %s1549_s5 = inlined_call_operand.vmem [shape: f32[1,32], index: 5, kind: input, shape index: {}]   ;;  %s1550_s6 = inlined_call_operand.hbm [shape: f32[2,8,32], index: 6, kind: output, shape index: {}]  }
   0x1   :  { %1555 = sst [smem:[#allocation21_spill]] %s1546_s2 }
   0x2   :  { %1556 = sst [smem:[#allocation22_spill]] %s1548_s4 }
   0x3   :  { %11 = vsyncpa [#allocation3], 0 }
   0x4   :  { %13 = vsyncpa [#allocation3 + $0x1], 0 }
   0x5   :  { %14 = vsyncpa [#allocation6], 0 }
   0x6   :  { %16 = vsyncpa [#allocation6 + $0x1], 0 }
   0x7   :  { %17 = vsyncpa [#allocation9], 0 }
   0x8   :  { %18 = vsyncpa [#allocation4], 0 }
   0x9   :  { %20 = vsyncpa [#allocation4 + $0x1], 0  ;;  %s1338_s21 = smov 0   ;;  %s1340_s22 = smov 0  }
   0xa   :  { %s1342_s23 = smov 0   ;;  %s1344_s24 = smov 0  }
   0xb   :  { %s1346_s25 = smov 0   ;;  %s1348_s26 = smov 0  }
   0xc LB: > { %1557 = sst [smem:[#allocation16_spill]] %s1261_s21  ;;  %s1369_s27 = sadd.s32 4294967295, %s1281_s26   ;;  %s1281_s26 = sphi %s1348_s26, %s26_s26   ;;  %s1277_s25 = sphi %s1346_s25, %s1577_s25   ;;  %s1273_s24 = sphi %s1344_s24, %s1576_s24   ;;  %s1269_s23 = sphi %s1342_s23, %s1572_s23   ;;  %s1265_s22 = sphi %s1340_s22, %s1575_s22   ;;  %s1261_s21 = sphi %s1338_s21, %s1574_s21  }
   0xd   : > { %1558 = sst [smem:[#allocation17_spill]] %s1269_s23  ;;  %p893_p0 = scmp.ge.s32.totalorder %s1281_s26, 1 }
   0xe   : > { %p59_p1 = scmp.eq.s32.totalorder %s1369_s27, 0  ;;  %p220_p2 = scmp.lt.s32.totalorder %s1281_s26, 3 }
   0xf   : > { %s1559_s2 = sld [smem:[#allocation21_spill]]  ;;  %s1283_s8 = smov [#allocation7]  }
  0x10   : > { %p1377_p3 = pnand %p893_p0, %p220_p2  ;;  %s236_s9 = sshll.u32 %s1283_s8, 4  ;;  %s237_s9 = int_to_ptr.vmem [resolvable:$true] %s236_s9 }
  0x11   : > { %p897_p6 = scmp.ge.s32.totalorder %s1281_s26, 2  ;;  %s1561_s4 = sld [smem:[#allocation22_spill]] }
  0x12   : > { %p953_p4 = pneg %p1377_p3  ;;  %s1284_s13 = smov 64  }
  0x13   : > { %s1285_s14 = smov 4   ;;  %s1286_s15 = smov [#allocation8]  }
  0x14   : > { %p954_p5 = pnand %p953_p4, %p59_p1  ;;  %s259_s16 = sshll.u32 %s1286_s15, 4  ;;  %s260_s16 = int_to_ptr.vmem [resolvable:$true] %s259_s16 }
  0x15   : > { %s234_s30 = sshll.u32 %s1559_s2, 4  ;;  %s892_s17 = sadd.s32 4294967294, %s1281_s26   ;;  %s235_s30 = int_to_ptr.hbm [resolvable:$true] %s234_s30 }
  0x16   : > { %956 = dma.hbm_to_vmem [thread:$0]  (!%p954_p5), %s235_s30, 256, %s237_s9, [#allocation6], %s1284_s13, %s1284_s13, %s1285_s14  }
  0x17   : > { %s257_s12 = sshll.u32 %s1561_s4, 4  ;;  %s38_s18 = sadd.s32 1, %s1277_s25  ;;  %s258_s12 = int_to_ptr.hbm [resolvable:$true] %s257_s12 }
  0x18   : > { %959 = dma.hbm_to_vmem [thread:$0]  (!%p954_p5), %s258_s12, 256, %s260_s16, [#allocation9], %s1284_s13, %s1284_s13, %s1285_s14  }
  0x19   : > { %p40_p7 = scmp.ge.s32.totalorder %s38_s18, 2  ;;  %s45_s19 = sadd.s32 1, %s1269_s23 }
  0x1a   : > { %p52_p8 = scmp.ne.s32.totalorder %s1269_s23, %s1265_s22  ;;  %p53_p9 = scmp.eq.s32.totalorder %s1281_s26, 0 }
  0x1b   : > { %s1579_s18 = smov (%p40_p7, %s38_s18), 0  ;;  %p58_p11 = scmp.ne.s32.totalorder %s1265_s22, %s1261_s21 }
  0x1c   : > { %1562 = sst [smem:[#allocation18_spill]] %s1579_s18  ;;  %p1397_p10 = por %p53_p9, %p52_p8 }
  0x1d   : > { %s42_s28 = ssub.s32 %s1277_s25, %s1579_s18  ;;  %p207_p12 = scmp.eq.s32.totalorder %s1369_s27, 1 }
  0x1e   : > { %p43_p13 = scmp.eq.s32.totalorder %s42_s28, 0  ;;  %p1408_p0 = por %p59_p1, %p58_p11 }
  0x1f   : > { %p1412_p2 = por %p207_p12, %p52_p8  ;;  %p213_p4 = scmp.eq.s32.totalorder %s892_s17, 1 }
  0x20   : > { %s1417_s8 = scalar_select %p43_p13, %s1269_s23, %s45_s19  }
  0x21   : > { %p1419_p5 = por %p213_p4, %p58_p11  ;;  %p973_p7 = scmp.lt.s32.totalorder %s1281_s26, 2 }
  0x22   : > { %1566 = sst [smem:[#allocation19_spill]] %s1417_s8  ;;  %s276_s10 = sand.u32 1, %s1269_s23  }
  0x23   : > { %s1567_s9 = scalar_select %p1419_p5, 1, 0 }
  0x24   : > { %s899_s11 = sshll.u32 %s1277_s25, 2  ;;  %s898_s12 = sshll.u32 %s276_s10, 2 }
  0x25   : > { %1568 = sst [smem:[#allocation20_spill]] %s1567_s9  ;;  %s284_s15 = scalar_lea.hbm %s1544_s0, %s899_s11 }
  0x26   : > { %s286_s16 = sshll.u32 %s284_s15, 4  ;;  %s280_s28 = scalar_lea.vmem [#allocation2], %s898_s12  ;;  %s287_s16 = int_to_ptr.hbm [resolvable:$true] %s286_s16 }
  0x27   : > { %s288_s2 = sshll.u32 %s280_s28, 4  ;;  %p961_p8 = pnand %p973_p7, %p1397_p10  ;;  %s289_s2 = int_to_ptr.vmem [resolvable:$true] %s288_s2 }
  0x28   : > { %s295_s17 = sand.u32 1, %s1281_s26   ;;  %s301_s18 = scalar_lea.hbm %s1545_s1, %s1277_s25 }
  0x29   : > { %s277_s8 = scalar_lea.sflag [#allocation3], %s276_s10  ;;  %s303_s23 = sshll.u32 %s301_s18, 4  ;;  %s304_s23 = int_to_ptr.hbm [resolvable:$true] %s303_s23 }
  0x2a   : > { %963 = dma.hbm_to_vmem [thread:$0]  (!%p961_p8), %s287_s16, 64, %s289_s2, %s277_s8  }
  0x2b   : > { %s298_s9 = scalar_lea.vmem [#allocation5], %s276_s10  ;;  %s296_s11 = scalar_lea.sflag [#allocation6], %s295_s17 }
  0x2c   : > { %s305_s21 = sshll.u32 %s298_s9, 4  ;;  %314 = sbr.rel (%p1377_p3) target bundleno = 1106 (0x452), region = 44  ;;  %s306_s21 = int_to_ptr.vmem [resolvable:$true] %s305_s21 }
  0x2d   : > { %966 = dma.hbm_to_vmem [thread:$0]  (!%p961_p8), %s304_s23, 16, %s306_s21, %s296_s11  }
  0x2e   : > { %s1439_s20 = sand.u32 (!%p1377_p3), 1, %s1265_s22  }
  0x2f   : > { %s901_s4 = sshll.u32 (!%p1377_p3), %s1439_s20, 2  ;;  %s317_s12 = scalar_lea.sflag (!%p1377_p3), [#allocation3], %s1439_s20 }
  0x30   : > { %s320_s13 = scalar_lea.vmem (!%p1377_p3), [#allocation2], %s901_s4 }
  0x31   : > { %1240 = dma.done.wait (%p1408_p0), %s317_s12, 64  }
  0x32   : > { %1242 = vsyncadd (%p1408_p0), %s317_s12, 4294967232  ;;  %s326_s2 = sand.u32 1, %s1369_s27   ;;  %s329_s23 = scalar_lea.vmem [#allocation5], %s1439_s20 }
  0x33   : > { %s327_s21 = scalar_lea.sflag [#allocation6], %s326_s2 }
  0x34   : > { %1244 = dma.done.wait (%p1408_p0), %s327_s21, 16  }
  0x35   : > { %1246 = vsyncadd (%p1408_p0), %s327_s21, 4294967280 }
  0x36   : > { %1248 = dma.done.wait (%p59_p1), [#allocation6], 256  }
  0x37   : > { %1250 = vsyncadd (%p59_p1), [#allocation6], 4294967040 }
  0x38   : > { %1252 = dma.done.wait (%p59_p1), [#allocation9], 256  }
  0x39   : > { %1254 = vsyncadd (%p59_p1), [#allocation9], 4294967040  ;;  %v936_v0 = vld [vmem:[#allocation7 + $0x8] sm:$0xff]  ;;  %v935_v1 = vld [vmem:[#allocation7] sm:$0xff]  ;;  %vm401_vm0 = vcmask 261120   ;;  %s1287_s27 = smov 104   ;;  %v418_v27 = vlaneseq }
  0x3a   : > { %411 = vmatpush.bf16.msra.mxu0 %v936_v0  ;;  %v380_v2 = vld [vmem:[%s320_s13] sm:$0xf]  ;;  %s1288_s29 = smov 120   ;;  %s1289_s8 = smov 96   ;;  %vm433_vm1 = vcmask 64512   ;;  %vm469_vm2 = vcmask 1043456  }
  0x3b   : > { %v1048_v3 = vld [vmem:[%s1547_s3] ss:$0 sm:$0xff]  ;;  %s1290_s9 = smov 80   ;;  %s1291_s10 = smov 72   ;;  %v419_v28 = vshrl.u32 %v418_v27, 7  ;;  %v421_v29 = vand.u32 127, %v418_v27 }
  0x3c   : > { %s1292_s14 = smov 88   ;;  %s1293_s15 = smov 64   ;;  %v1049_v30 = vld [vmem:[%s329_s23] ss:$0 sm:$0xff]  ;;  %v1296_v31 = vmov 0.0   ;;  %vm689_vm4 = vcmask 130048  }
  0x3d   : > { %s1294_s16 = smov 112   ;;  %s1295_s28 = smov 56   ;;  %vm422_vm3 = vcmp.gt.s32.totalorder %v421_v29, %v419_v28  ;;  %vm691_vm5 = vcmask 195584  }
  0x3e   : > { %412 = vmatpush.bf16.msra.mxu0 %v935_v1  ;;  %v423_v32 = vsel %vm422_vm3, -1e+30, %v1296_v31  ;;  %s1297_s17 = smov 48   ;;  %s1298_s19 = smov 40  }
  0x3f   : > { %v428_v33 = vadd.f32 %v1049_v30, %v423_v32  ;;  %s1300_s11 = smov 8   ;;  %s1301_s4 = smov 16  }
  0x40   : > { %s1302_s12 = smov 24   ;;  %s932_s13 = sshll.u32 %s1273_s24, 3 }
  0x41   : > { %913 = vmatmul.msk.bf16.vlgmr.msra.gmra.mxu0 %vm401_vm0, %v380_v2  ;;  %s904_s2 = sshll.u32 %s1439_s20, 3  ;;  %s754_s7 = scalar_lea.hbm %s1550_s6, %s932_s13 }
  0x42   : > { %s744_s24 = scalar_lea.sflag [#allocation4], %s1439_s20 }
  0xbe   : > { %v414_v4 = vpop.f32.mrf.mxu0 }
  0xbf   : > { %v1465_v5 = vadd.f32 %v1048_v3, %v414_v4 }
  0xc1   : > { %v429_v6 = vpack.c.bf16 %v1465_v5, %v1465_v5 }
  0xc3   : > { %615 = vrot.lane.b32.xlu2 %v429_v6, %s1287_s27  ;;  %493 = vrot.lane.b32.xlu1 %v429_v6, %s1288_s29  ;;  %s375_s29 = scalar_lea.vmem [#allocation10], %s904_s2 }
  0xc4   : > { %431 = vrot.lane.b32.xlu0 %v429_v6, %s1289_s8  ;;  %s756_s8 = sshll.u32 %s375_s29, 4  ;;  %s757_s8 = int_to_ptr.vmem [resolvable:$true] %s756_s8 }
  0xc6   : > { %v416_v7 = vpop.f32.mrf.mxu0 }
  0xcb   : > { %556 = vrot.lane.b32.xlu2 %v429_v6, %s1290_s9  ;;  %617 = vrot.lane.b32.xlu1 %v429_v6, %s1291_s10  ;;  %s758_s9 = sshll.u32 %s754_s7, 4  ;;  %s759_s9 = int_to_ptr.hbm [resolvable:$true] %s758_s9 }
  0xcc   : > { %495 = vrot.lane.b32.xlu0 %v429_v6, %s1292_s14  ;;  %s1201_s10 = sshra.s32 %s759_s9, 4  ;;  %s1202_s10 = int_to_ptr.hbm [resolvable:$true] %s1201_s10 }
  0xcd   : > { %s1203_s14 = scalar_lea.hbm %s1202_s10, 8  ;;  %p1208_p10 = scmp.lt.s32.totalorder %s1202_s10, %s1550_s6 }
  0xce   : > { %p1204_p1 = scmp.ne.s32.totalorder %s1202_s10, %s1203_s14 }
  0xd0   : > { %p1205_p3 = pnand %p1204_p1, %p1412_p2 }
  0xd2   : > { %p1206_p9 = pneg %p1205_p3 }
  0xd3   : > { %460 = vrot.lane.b32.xlu2 %v1465_v5, %s1293_s15 }
  0xd4   : > { %554 = vrot.lane.b32.xlu0 %v429_v6, %s1294_s16 }
  0xdb   : > { %522 = vrot.lane.b32.xlu2 %v1465_v5, %s1295_s28  ;;  %s1207_s28 = scalar_lea.hbm %s1550_s6, 16 }
  0xdc   : > { %p1209_p11 = scmp.lt.s32.totalorder %s1207_s28, %s1203_s14 }
  0xde   : > { %p1210_p12 = por %p1209_p11, %p1208_p10 }
  0xe0   : > { %p1211_p13 = pnand %p1210_p12, %p1206_p9 }
 0x11d   : > { %v616_v8 = vpop.permute.xlu2 %615 }
 0x125   : > { %v557_v9 = vpop.permute.xlu2 %556 }
 0x126   : > { %v562_v10 = vsel %vm433_vm1, %v557_v9, 0 }
 0x127   : > { %571 = vmatpush.bf16.xpose.msrb.mxu0 %v562_v10 }
 0x12d   : > { %v461_v11 = vpop.permute.xlu2 %460 }
 0x12e   : > { %v463_v12 = vsel %vm433_vm1, %v461_v11, 1.0 }
 0x12f   : > { %v465_v13 = vpack.c.bf16 %v463_v12, %v463_v12 }
 0x131   : > { %v471_v14 = vsel %vm469_vm2, %v465_v13, 0 }
 0x132   : > { %480 = vmatpush.bf16.msra.mxu2 %v471_v14  ;;  %v1299_v14 = vmov 8  }
 0x133   : > { %1045 = vset.pattern.permute.xlu2 %v1299_v14  ;;  %1046 = vset.pattern.permute.xlu0 %v1299_v14 }
 0x134   : > { %1047 = vset.pattern.permute.xlu1 %v1299_v14 }
 0x135   : > { %v523_v15 = vpop.permute.xlu2 %522  ;;  %v494_v16 = vpop.permute.xlu1 %493 }
 0x136   : > { %v525_v17 = vsel %vm433_vm1, %v523_v15, 1.0  ;;  %v432_v18 = vpop.permute.xlu0 %431 }
 0x137   : > { %v527_v19 = vpack.c.bf16 %v525_v17, %v525_v17  ;;  %v438_v20 = vsel %vm433_vm1, %v432_v18, 0 }
 0x138   : > { %447 = vmatpush.bf16.xpose.msra.mxu1 %v438_v20 }
 0x139   : > { %v532_v21 = vsel %vm469_vm2, %v527_v19, 0 }
 0x13a   : > { %541 = vmatpush.bf16.msrb.mxu2 %v532_v21 }
 0x13d   : > { %v618_v22 = vpop.permute.xlu1 %617 }
 0x13e   : > { %v496_v23 = vpop.permute.xlu0 %495  ;;  %v623_v24 = vsel %vm433_vm1, %v618_v22, 0 }
 0x13f   : > { %914 = vmatmul.msk.bf16.vlgmr.msra.gmra.mxu1 %vm433_vm1, %v429_v6  ;;  %v501_v25 = vsel %vm433_vm1, %v496_v23, 0 }
 0x140   : > { %510 = vmatpush.bf16.xpose.msra.mxu3 %v501_v25 }
 0x146   : > { %v555_v26 = vpop.permute.xlu0 %554 }
 0x147   : > { %916 = vmatmul.msk.bf16.vlgmr.msra.gmra.mxu3 %vm433_vm1, %v494_v16  ;;  %918 = vmatmul.msk.bf16.vlgmr.msrb.gmra.mxu0 %vm433_vm1, %v555_v26 }
 0x148   : > { %632 = vmatpush.bf16.xpose.msrb.mxu3 %v623_v24 }
 0x157   : > { %920 = vmatmul.msk.bf16.vlgmr.msrb.gmra.mxu3 %vm433_vm1, %v616_v8 }
 0x1bc   : > { %v449_v34 = vpop.f32.mrf.mxu1 }
 0x1bd   : > { %v450_v35 = vadd.f32 %v449_v34, %v428_v33  ;;  %v937_v34 = vld [vmem:[#allocation8] sm:$0xff] }
 0x1bf   : > { %v453_v36 = vsel %vm433_vm1, %v450_v35, -inf }
 0x1c0   : > { %454 = vmax.xlane.f32.xlu1 %v453_v36 }
 0x1c4   : > { %v451_v37 = vpop.f32.mrf.mxu1  ;;  %v573_v38 = vpop.f32.mrf.mxu0 }
 0x1c5   : > { %v574_v39 = vadd.f32 %v573_v38, %v428_v33 }
 0x1c7   : > { %v577_v40 = vsel %vm433_vm1, %v574_v39, -inf }
 0x1c8   : > { %578 = vmax.xlane.f32.xlu1 %v577_v40 }
 0x1ca   : > { %v512_v41 = vpop.f32.mrf.mxu3 }
 0x1cb   : > { %v513_v42 = vadd.f32 %v512_v41, %v428_v33 }
 0x1cc   : > { %v575_v43 = vpop.f32.mrf.mxu0 }
 0x1cd   : > { %v516_v44 = vsel %vm433_vm1, %v513_v42, -inf }
 0x1ce   : > { %517 = vmax.xlane.f32.xlu0 %v516_v44  ;;  %v1050_v44 = vld [vmem:[%s1549_s5] ss:$0 sm:$0xff] }
 0x1d2   : > { %v514_v45 = vpop.f32.mrf.mxu3 }
 0x1da   : > { %v634_v46 = vpop.f32.mrf.mxu3 }
 0x1db   : > { %v635_v47 = vadd.f32 %v634_v46, %v428_v33  ;;  %v938_v33 = vld [vmem:[#allocation8 + $0x8] sm:$0xff] }
 0x1dc   : > { %719 = vmatpush.bf16.msra.mxu0 %v938_v33 }
 0x1dd   : > { %v638_v48 = vsel %vm433_vm1, %v635_v47, -inf }
 0x1de   : > { %639 = vmax.xlane.f32.xlu2 %v638_v48 }
 0x1e0   : > { %720 = vmatpush.bf16.msra.mxu0 %v937_v34 }
 0x1e1   : > { %583 = vrot.lane.b32.xlu1 %v1465_v5, %s1297_s17 }
 0x1e2   : > { %v636_v49 = vpop.f32.mrf.mxu3  ;;  %644 = vrot.lane.b32.xlu0 %v1465_v5, %s1298_s19 }
 0x233   : > { %v455_v50 = vpop.xlane.xlu1 %454 }
 0x234   : > { %v456_v51 = vsub.f32 %v450_v35, %v455_v50 }
 0x236   : > { %v457_v52 = vmul.f32 1.442695, %v456_v51 }
 0x238   : > { %1051 = vpow2.f32 %v457_v52 }
 0x23b   : > { %v579_v58 = vpop.xlane.xlu1 %578 }
 0x23c   : > { %v580_v59 = vsub.f32 %v574_v39, %v579_v58 }
 0x23e   : > { %v1052_v53 = vpop.eup %1051  ;;  %v581_v61 = vmul.f32 1.442695, %v580_v59 }
 0x23f   : > { %v464_v54 = vpack.c.bf16 %v1052_v53, %v1052_v53 }
 0x241   : > { %915 = vmatmul.msk.bf16.vlgmr.msra.gmra.mxu2 %vm433_vm1, %v464_v54  ;;  %v518_v55 = vpop.xlane.xlu0 %517 }
 0x242   : > { %v519_v56 = vsub.f32 %v513_v42, %v518_v55 }
 0x244   : > { %v520_v57 = vmul.f32 1.442695, %v519_v56 }
 0x246   : > { %1053 = vpow2.f32 %v520_v57 }
 0x247   : > { %1055 = vpow2.f32 %v581_v61 }
 0x24c   : > { %v1054_v60 = vpop.eup %1053 }
 0x24d   : > { %v526_v62 = vpack.c.bf16 %v1054_v60, %v1054_v60  ;;  %v1056_v7 = vpop.eup %1055 }
 0x24e   : > { %v587_v11 = vpack.c.bf16 %v1056_v7, %v1056_v7 }
 0x251   : > { %v640_v63 = vpop.xlane.xlu2 %639  ;;  %917 = vmatmul.msk.bf16.vlgmr.msrb.gmra.mxu2 %vm433_vm1, %v526_v62 }
 0x252   : > { %v641_v0 = vsub.f32 %v635_v47, %v640_v63 }
 0x253   : > { %v584_v1 = vpop.permute.xlu1 %583 }
 0x254   : > { %v642_v2 = vmul.f32 1.442695, %v641_v0  ;;  %v586_v3 = vsel %vm433_vm1, %v584_v1, 1.0  ;;  %v645_v4 = vpop.permute.xlu0 %644 }
 0x255   : > { %v588_v5 = vpack.c.bf16 %v586_v3, %v586_v3  ;;  %v647_v6 = vsel %vm433_vm1, %v645_v4, 1.0 }
 0x256   : > { %1057 = vpow2.f32 %v642_v2  ;;  %v649_v8 = vpack.c.bf16 %v647_v6, %v647_v6 }
 0x257   : > { %v593_v9 = vsel %vm469_vm2, %v588_v5, 0 }
 0x258   : > { %v654_v10 = vsel %vm469_vm2, %v649_v8, 0  ;;  %602 = vmatpush.bf16.msrb.mxu1 %v593_v9 }
 0x259   : > { %663 = vmatpush.bf16.msra.mxu2 %v654_v10 }
 0x25b   : > { %919 = vmatmul.msk.bf16.vlgmr.msrb.gmra.mxu1 %vm433_vm1, %v587_v11 }
 0x25c   : > { %v1058_v12 = vpop.eup %1057 }
 0x25d   : > { %v648_v13 = vpack.c.bf16 %v1058_v12, %v1058_v12 }
 0x261   : > { %921 = vmatmul.msk.bf16.vlgmr.msra.gmra.mxu2 %vm433_vm1, %v648_v13 }
 0x2c4   : > { %v482_v15 = vpop.f32.mrf.mxu2 }
 0x2cc   : > { %v484_v16 = vpop.f32.mrf.mxu2 }
 0x2d4   : > { %v543_v17 = vpop.f32.mrf.mxu2 }
 0x2d5   : > { %1059 = vrcp.f32 %v543_v17 }
 0x2d8   : > { %v604_v18 = vpop.f32.mrf.mxu1 }
 0x2d9   : > { %1061 = vrcp.f32 %v604_v18 }
 0x2da   : > { %1063 = vrcp.f32 %v482_v15 }
 0x2db   : > { %v1060_v19 = vpop.eup %1059 }
 0x2dc   : > { %550 = vperm.xlu2 %1045, %v1060_v19   ;;  %v545_v20 = vpop.f32.mrf.mxu2 }
 0x2df   : > { %v1062_v21 = vpop.eup %1061 }
 0x2e0   : > { %611 = vperm.xlu0 %1046, %v1062_v21   ;;  %v606_v22 = vpop.f32.mrf.mxu1  ;;  %v1064_v23 = vpop.eup %1063 }
 0x2e4   : > { %489 = vperm.xlu2 %1045, %v1064_v23   ;;  %v665_v24 = vpop.f32.mrf.mxu2 }
 0x2e5   : > { %1065 = vrcp.f32 %v665_v24 }
 0x2eb   : > { %v1066_v25 = vpop.eup %1065 }
 0x2ec   : > { %672 = vperm.xlu1 %1047, %v1066_v25   ;;  %v667_v26 = vpop.f32.mrf.mxu2 }
 0x336   : > { %v551_v27 = vpop.permute.xlu2 %550 }
 0x337   : > { %v553_v28 = vmul.f32 %v551_v27, %v543_v17 }
 0x339   : > { %677 = vrot.lane.b32.xlu1 %v553_v28, %s1300_s11 }
 0x33e   : > { %v490_v35 = vpop.permute.xlu2 %489 }
 0x33f   : > { %v492_v37 = vmul.f32 %v490_v35, %v482_v15 }
 0x352   : > { %v612_v29 = vpop.permute.xlu0 %611 }
 0x353   : > { %v614_v30 = vmul.f32 %v612_v29, %v604_v18 }
 0x355   : > { %681 = vrot.lane.b32.xlu0 %v614_v30, %s1301_s4 }
 0x35e   : > { %v673_v31 = vpop.permute.xlu1 %672 }
 0x35f   : > { %v675_v32 = vmul.f32 %v673_v31, %v665_v24 }
 0x361   : > { %685 = vrot.lane.b32.xlu2 %v675_v32, %s1302_s12 }
 0x3ab   : > { %v678_v36 = vpop.permute.xlu1 %677 }
 0x3ac   : > { %v688_v38 = vsel %vm433_vm1, %v492_v37, %v678_v36 }
 0x3bb   : > { %v686_v40 = vpop.permute.xlu2 %685 }
 0x3c7   : > { %v682_v39 = vpop.permute.xlu0 %681 }
 0x3c8   : > { %v690_v41 = vsel %vm689_vm4, %v688_v38, %v682_v39 }
 0x3c9   : > { %v692_v42 = vsel %vm691_vm5, %v690_v41, %v686_v40 }
 0x3ca   : > { %v693_v43 = vpack.c.bf16 %v692_v42, %v692_v42 }
 0x3cc   : > { %930 = vmatmul.msk.bf16.vlgmr.msra.gmra.mxu0 %vm401_vm0, %v693_v43 }
 0x449   : > { %v722_v45 = vpop.f32.mrf.mxu0 }
 0x44a   : > { %v734_v46 = vadd.f32 %v1050_v44, %v722_v45 }
 0x44c   : > { %735 = vst.msk [vmem:[%s375_s29] sm:$0xff] %vm401_vm0, %v734_v46 }
 0x44d   : > { %1214 = shalt.err (!%p1211_p13)
}
 0x44e   : > { %951 = dma.vmem_to_hbm [thread:$0]  (%p1412_p2), %s757_s8, 128, %s759_s9, %s744_s24  }
 0x451   : > { %v724_v47 = vpop.f32.mrf.mxu0 }
 0x452 PF: > { %s1569_s20 = sld [smem:[#allocation16_spill]]  ;;  %p968_p0 = pnand %p897_p6, %p1419_p5 }
 0x454   : > { %p969_p4 = pneg %p968_p0 }
 0x458   : > { %s770_s4 = sand.u32 1, %s1569_s20  }
 0x459   : > { %s771_s12 = scalar_lea.sflag [#allocation4], %s770_s4 }
 0x45a   : > { %1256 = dma.done.wait (%p969_p4), %s771_s12, 128  }
 0x45b   : > { %1258 = vsyncadd (%p969_p4), %s771_s12, 4294967168  ;;  %s26_s26 = sadd.s32 1, %s1281_s26   ;;  %s1571_s13 = sld [smem:[#allocation17_spill]] }
 0x45c   : > { %p23_p7 = scmp.ge.s32.totalorder %s26_s26, 4   ;;  %s1572_s23 = sld [smem:[#allocation19_spill]] }
 0x45d   : > { %s1573_s30 = sld [smem:[#allocation18_spill]]  ;;  %s1574_s21 = smov %s1265_s22 }
 0x45e   : > { %s1576_s24 = smov %s1277_s25 }
 0x45f   :  { %25 = sbr.rel (!%p23_p7) target bundleno = 12 (0xc), region = 123 }
 0x461   : > { %s1575_s22 = smov %s1571_s13 }
 0x463   : > { %s1577_s25 = smov %s1573_s30 }
 0x464   :  { %777 = vsyncpa [#allocation3], 1 }
 0x465   :  { %779 = vsyncpa [#allocation3 + $0x1], 1 }
 0x466   :  { %780 = vsyncpa [#allocation6], 1 }
 0x467   :  { %782 = vsyncpa [#allocation6 + $0x1], 1 }
 0x468   :  { %783 = vsyncpa [#allocation9], 1 }
 0x469   :  { %784 = vsyncpa [#allocation4], 1 }
 0x46a   :  { %786 = vsyncpa [#allocation4 + $0x1], 1 }

</bundles_post_ra>
